<compile_context>
chip_gen: v7x
topology: tpu7x:2x2x1
jax: 0.10.0
libtpu: 0.0.40
codegen_flags: <defaults>
</compile_context>

<pallas_src>
import functools
from typing import NamedTuple

import jax
import jax.numpy as jnp
from jax import lax
from jax.experimental import pallas as pl
from jax.experimental.pallas import tpu as pltpu


def _round_up(x, m):
    return (x + m - 1) // m * m


def _sepconv_kernel(x_ref, w_ref, shift_ref, o_ref, xp_s, lhs_s, *,
                    Nb, KH, stride, dilation, H_out, pad_h, padL, H, WC):
    # x_ref:     (Nb, H, W*C_in)                block of images, lane-dense NHWC-flattened
    # w_ref:     (KH*WpC_pad, W_out*C_out)      fused banded weights (dw*pw*bn_scale), bf16
    # shift_ref: (1, W_out*C_out)               BN shift tiled over W_out, f32
    # o_ref:     (Nb, H_out, W_out*C_out)       lane-dense output
    # xp_s:      (Nb*Hp, WpC_pad) f32           padded, ReLU'd images (per-band K width padded to 128)
    # lhs_s:     (Nb*H_out, KH*WpC_pad) bf16    im2row LHS over the KH height taps
    Hp = H + 2 * pad_h
    WpC_pad = xp_s.shape[1]
    padR = WpC_pad - padL - WC

    # 1) Zero only the pad border + lane-padding strip (interior is fully overwritten below).
    #    Redone every step, so it stays correct under megacore/parallel grid splitting.
    if padL > 0:
        xp_s[:, pl.ds(0, padL)] = jnp.zeros((Nb * Hp, padL), xp_s.dtype)
    if padR > 0:
        xp_s[:, pl.ds(padL + WC, padR)] = jnp.zeros((Nb * Hp, padR), xp_s.dtype)
    for n in range(Nb):
        if pad_h > 0:
            xp_s[pl.ds(n * Hp, pad_h), pl.ds(padL, WC)] = (
                jnp.zeros((pad_h, WC), xp_s.dtype))
            xp_s[pl.ds(n * Hp + pad_h + H, pad_h), pl.ds(padL, WC)] = (
                jnp.zeros((pad_h, WC), xp_s.dtype))
        # 2) ReLU into the interior (relu(0) == 0, so ReLU and zero-pad commute).
        xp_s[pl.ds(n * Hp + pad_h, H), pl.ds(padL, WC)] = jnp.maximum(
            x_ref[n].astype(jnp.float32), 0.0)

    # 3) im2row over the KH height taps only -> one lane-aligned bf16 LHS.
    for n in range(Nb):
        for kh in range(KH):
            h0 = n * Hp + kh * dilation
            if stride == 1:
                rows = xp_s[pl.ds(h0, H_out), :]
            else:
                span = xp_s[pl.ds(h0, (H_out - 1) * stride + 1), :]
                rows = lax.slice(span, (0, 0), span.shape, (stride, 1))
            lhs_s[pl.ds(n * H_out, H_out),
                  pl.ds(kh * WpC_pad, WpC_pad)] = rows.astype(lhs_s.dtype)

    # 4) Single fused MXU matmul (bf16 operands, f32 accumulation), K = KH*WpC_pad.
    acc = jnp.dot(lhs_s[...], w_ref[...], preferred_element_type=jnp.float32)
    out = acc + shift_ref[...]
    for n in range(Nb):
        o_ref[n] = out[n * H_out:(n + 1) * H_out].astype(o_ref.dtype)


class PackedSepConv(NamedTuple):
    w_big: jax.Array      # (KH * WpC_pad, W_out * C_out), compute dtype
    shift: jax.Array      # (1, W_out * C_out), f32
    KH: int
    C_in: int
    C_out: int
    H: int
    W: int
    H_out: int
    W_out: int
    stride: int
    padding: int
    dilation: int
    WpC_pad: int


def pack_sepconv_weights(dw_w, pw_w, bn_gamma, bn_beta, bn_mean, bn_var, *,
                         H, W, stride=1, padding=1, dilation=1, eps=1e-5,
                         compute_dtype=jnp.bfloat16):
    """Per-weight-set preprocessing (hoisted off the forward path).

    dw_w: (C_in, 1, KH, KW) depthwise.  pw_w: (C_out, C_in, 1, 1) pointwise.
    BN (eval mode) scale is folded into the weight, shift kept as an additive term.
    """
    C_in = dw_w.shape[0]
    C_out = pw_w.shape[0]
    KH, KW = dw_w.shape[2], dw_w.shape[3]
    H_out = (H + 2 * padding - dilation * (KH - 1) - 1) // stride + 1
    W_out = (W + 2 * padding - dilation * (KW - 1) - 1) // stride + 1
    Wp = W + 2 * padding
    WpC = Wp * C_in
    WpC_pad = _round_up(WpC, 128)

    inv_std = 1.0 / jnp.sqrt(bn_var.astype(jnp.float32) + eps)
    scale = bn_gamma.astype(jnp.float32) * inv_std                       # (C_out,)
    shift = bn_beta.astype(jnp.float32) - bn_mean.astype(jnp.float32) * scale

    dw = jnp.transpose(dw_w[:, 0, :, :], (1, 2, 0)).astype(jnp.float32)  # (KH, KW, C_in)
    pw = jnp.transpose(pw_w[:, :, 0, 0], (1, 0)).astype(jnp.float32)     # (C_in, C_out)
    pw_scaled = pw * scale[None, :]
    w_comb = dw[:, :, :, None] * pw_scaled[None, None, :, :]             # (KH,KW,Cin,Cout)

    # Banded expansion over padded width: sel[kw, wp, w] = 1 iff wp == w*stride + kw*dilation.
    # TODO(synk): for production widths replace this with a compact (KH*KW*C_in, C_out)
    # weight + im2col LHS per W_out tile (the banded form duplicates pw W_out times).
    sel = (jnp.arange(Wp)[None, :, None] ==
           (jnp.arange(W_out)[None, None, :] * stride +
            jnp.arange(KW)[:, None, None] * dilation)).astype(jnp.float32)
    w_band = jnp.einsum('kpw,akco->apcwo', sel, w_comb)                  # (KH,Wp,Cin,Wout,Cout)
    w_band = w_band.reshape(KH, WpC, W_out * C_out)
    w_band = jnp.pad(w_band, ((0, 0), (0, WpC_pad - WpC), (0, 0)))       # lane-align each K band
    w_big = w_band.reshape(KH * WpC_pad, W_out * C_out).astype(compute_dtype)

    shift_wide = jnp.tile(shift, (W_out,)).reshape(1, W_out * C_out)

    return PackedSepConv(w_big=w_big, shift=shift_wide, KH=KH, C_in=C_in, C_out=C_out,
                         H=H, W=W, H_out=H_out, W_out=W_out, stride=stride,
                         padding=padding, dilation=dilation, WpC_pad=WpC_pad)


def _pick_block_n(N, H_out, target_m=128):
    """Largest divisor of N whose block gives matmul M = Nb*H_out close to target_m."""
    nb = max(1, min(N, target_m // max(H_out, 1)))
    while N % nb:
        nb -= 1
    return nb


def sep_conv_apply(x_nchw, p: PackedSepConv):
    """x_nchw: (N, C_in, H, W) -> (N, C_out, H_out, W_out)."""
    N, C_in, H, W = x_nchw.shape
    assert (C_in, H, W) == (p.C_in, p.H, p.W)
    WC = W * C_in
    WoutC = p.W_out * p.C_out
    Hp = H + 2 * p.padding
    Nb = _pick_block_n(N, p.H_out)
    # TODO(synk): on v7x keep >= 2 "parallel" grid steps (split N or H_out halves) so both
    # TensorCores are used; on v5e/v6e the fewest, largest steps are best.

    # Single wrapper transpose NCHW -> NHWC, then a free contiguous flatten of (W, C).
    # TODO(synk): if the surrounding graph can produce/consume NHWC, drop both transposes
    # and feed/return the lane-dense layout directly.
    x_flat = jnp.transpose(x_nchw, (0, 2, 3, 1)).reshape(N, H, WC)

    kernel = functools.partial(
        _sepconv_kernel, Nb=Nb, KH=p.KH, stride=p.stride, dilation=p.dilation,
        H_out=p.H_out, pad_h=p.padding, padL=p.padding * C_in, H=H, WC=WC)

    out_flat = pl.pallas_call(
        kernel,
        out_shape=jax.ShapeDtypeStruct((N, p.H_out, WoutC), x_nchw.dtype),
        grid=(N // Nb,),
        in_specs=[
            pl.BlockSpec((Nb, H, WC), lambda n: (n, 0, 0)),
            # Grid-invariant weight / shift.
            # TODO(synk): at production sizes tile over W_out and single-buffer these
            # (pipeline_mode=pl.Buffered(1)) to keep the v7x 64 MiB VMEM budget.
            pl.BlockSpec((p.KH * p.WpC_pad, WoutC), lambda n: (0, 0)),
            pl.BlockSpec((1, WoutC), lambda n: (0, 0)),
        ],
        out_specs=pl.BlockSpec((Nb, p.H_out, WoutC), lambda n: (n, 0, 0)),
        scratch_shapes=[
            pltpu.VMEM((Nb * Hp, p.WpC_pad), jnp.float32),                 # padded ReLU'd images
            pltpu.VMEM((Nb * p.H_out, p.KH * p.WpC_pad), p.w_big.dtype),   # fused im2row LHS
        ],
        compiler_params=pltpu.CompilerParams(
            dimension_semantics=("parallel",)),
        # TODO(synk): raise vmem_limit_bytes (~96 MiB v5e/v6e, <=48 MiB v7x) once per-step
        # tiles grow for production shapes; the default scoped limit suffices here.
    )(x_flat, p.w_big, p.shift)

    out = out_flat.reshape(N, p.H_out, p.W_out, p.C_out)
    return jnp.transpose(out, (0, 3, 1, 2))                               # back to NCHW


def sep_conv_ref(x, dw_w, pw_w, gamma, beta, mean, var,
                 *, stride=1, padding=1, dilation=1, eps=1e-5):
    """Pure-JAX reference (NCHW) mirroring the PyTorch module in eval mode."""
    y = jnp.maximum(x, 0.0)
    y = lax.conv_general_dilated(
        y, dw_w, window_strides=(stride, stride),
        padding=((padding, padding), (padding, padding)),
        rhs_dilation=(dilation, dilation),
        dimension_numbers=('NCHW', 'OIHW', 'NCHW'),
        feature_group_count=x.shape[1])
    y = lax.conv_general_dilated(
        y, pw_w, (1, 1), 'VALID',
        dimension_numbers=('NCHW', 'OIHW', 'NCHW'))
    s = gamma / jnp.sqrt(var + eps)
    return y * s[None, :, None, None] + (beta - mean * s)[None, :, None, None]


if __name__ == "__main__":
    # SepConv(C_in=4, C_out=8, kernel_size=3, stride=1, padding=1, dilation=1, affine=True)
    N, C_in, C_out, H, W = 2, 4, 8, 16, 16
    KH = KW = 3
    stride, padding, dilation = 1, 1, 1

    key = jax.random.PRNGKey(0)
    k_x, k_dw, k_pw, k_g, k_b, k_m, k_v = jax.random.split(key, 7)

    x = jax.random.normal(k_x, (N, C_in, H, W), dtype=jnp.float32)
    dw_w = jax.random.normal(k_dw, (C_in, 1, KH, KW), dtype=jnp.float32) * 0.2
    pw_w = jax.random.normal(k_pw, (C_out, C_in, 1, 1), dtype=jnp.float32) * 0.2
    bn_gamma = 1.0 + 0.1 * jax.random.normal(k_g, (C_out,), dtype=jnp.float32)
    bn_beta = 0.1 * jax.random.normal(k_b, (C_out,), dtype=jnp.float32)
    bn_mean = 0.1 * jax.random.normal(k_m, (C_out,), dtype=jnp.float32)
    bn_var = jnp.abs(jax.random.normal(k_v, (C_out,), dtype=jnp.float32)) + 0.5
    # TODO(synk): training-mode BatchNorm (batch statistics) not implemented; eval-mode
    # running-stat normalization is folded into the packed weights/shift.

    # Weight packing is done ONCE per weight set (off the inference critical path).
    packed = pack_sepconv_weights(dw_w, pw_w, bn_gamma, bn_beta, bn_mean, bn_var,
                                  H=H, W=W, stride=stride, padding=padding,
                                  dilation=dilation)

    out = sep_conv_apply(x, packed)
    out = jax.block_until_ready(out)

    ref = sep_conv_ref(x, dw_w, pw_w, bn_gamma, bn_beta, bn_mean, bn_var,
                       stride=stride, padding=padding, dilation=dilation)
    assert out.shape == (N, C_out, H, W)
    err = float(jnp.max(jnp.abs(out - ref)))
    # bf16 MXU operands with f32 accumulation -> looser tolerance than pure f32.
    assert err < 5e-2, f"max abs error {err}"

    print("KERNEL_OK")
</pallas_src>

<mosaic_0001>
module attributes {stable_mosaic.version = 11 : i64} {
  func.func @_sepconv_kernel(%arg0: i32, %arg1: memref<2x16x64xf32, #tpu.memory_space<vmem>>, %arg2: memref<384x128xbf16, #tpu.memory_space<vmem>>, %arg3: memref<1x128xf32, #tpu.memory_space<vmem>>, %arg4: memref<2x16x128xf32, #tpu.memory_space<vmem>>, %arg5: memref<36x128xf32, #tpu.memory_space<vmem>>, %arg6: memref<32x384xbf16, #tpu.memory_space<vmem>>) attributes {dimension_semantics = [#tpu.dimension_semantics<parallel>], iteration_bounds = array<i64: 1>, scalar_prefetch = 0 : i64, scratch_operands = 2 : i64, tpu.core_type = #tpu.core_type<tc>, window_params = [{transform_indices = @transform_0, window_bounds = array<i64: 2, 16, 64>}, {pipeline_mode = #tpu.pipeline_mode<synchronous>, transform_indices = @transform_1, window_bounds = array<i64: 384, 128>}, {pipeline_mode = #tpu.pipeline_mode<synchronous>, transform_indices = @transform_2, window_bounds = array<i64: 1, 128>}, {transform_indices = @transform_3, window_bounds = array<i64: 2, 16, 128>}]} {
    %cst = arith.constant 0.000000e+00 : f32
    %0 = vector.broadcast %cst : f32 to vector<36x4xf32>
    %c0 = arith.constant 0 : index
    %c0_0 = arith.constant 0 : index
    %1 = vector.load %arg5[%c0, %c0_0] : memref<36x128xf32, #tpu.memory_space<vmem>>, vector<36x4xf32>
    tpu.vector_store %arg5[%c0, %c0_0], %0 {strides = array<i32>} : memref<36x128xf32, #tpu.memory_space<vmem>>, vector<36x4xf32>,
    %cst_1 = arith.constant 0.000000e+00 : f32
    %2 = vector.broadcast %cst_1 : f32 to vector<36x60xf32>
    %c0_2 = arith.constant 0 : index
    %c68 = arith.constant 68 : index
    %3 = vector.load %arg5[%c0_2, %c68] : memref<36x128xf32, #tpu.memory_space<vmem>>, vector<36x60xf32>
    tpu.vector_store %arg5[%c0_2, %c68], %2 {strides = array<i32>} : memref<36x128xf32, #tpu.memory_space<vmem>>, vector<36x60xf32>,
    %cst_3 = arith.constant 0.000000e+00 : f32
    %4 = vector.broadcast %cst_3 : f32 to vector<1x64xf32>
    %c0_4 = arith.constant 0 : index
    %c4 = arith.constant 4 : index
    %5 = vector.load %arg5[%c0_4, %c4] : memref<36x128xf32, #tpu.memory_space<vmem>>, vector<1x64xf32>
    tpu.vector_store %arg5[%c0_4, %c4], %4 {strides = array<i32>} : memref<36x128xf32, #tpu.memory_space<vmem>>, vector<1x64xf32>,
    %cst_5 = arith.constant 0.000000e+00 : f32
    %6 = vector.broadcast %cst_5 : f32 to vector<1x64xf32>
    %c17 = arith.constant 17 : index
    %c4_6 = arith.constant 4 : index
    %7 = vector.load %arg5[%c17, %c4_6] : memref<36x128xf32, #tpu.memory_space<vmem>>, vector<1x64xf32>
    tpu.vector_store %arg5[%c17, %c4_6], %6 {strides = array<i32>} : memref<36x128xf32, #tpu.memory_space<vmem>>, vector<1x64xf32>,
    %c0_7 = arith.constant 0 : index
    %c0_8 = arith.constant 0 : index
    %c0_9 = arith.constant 0 : index
    %8 = vector.load %arg1[%c0_7, %c0_8, %c0_9] : memref<2x16x64xf32, #tpu.memory_space<vmem>>, vector<1x16x64xf32>
    %9 = vector.shape_cast %8 : vector<1x16x64xf32> to vector<16x64xf32>
    %cst_10 = arith.constant 0.000000e+00 : f32
    %10 = vector.broadcast %cst_10 : f32 to vector<16x64xf32>
    %11 = arith.maximumf %9, %10 : vector<16x64xf32>
    %c1 = arith.constant 1 : index
    %c4_11 = arith.constant 4 : index
    %12 = vector.load %arg5[%c1, %c4_11] : memref<36x128xf32, #tpu.memory_space<vmem>>, vector<16x64xf32>
    tpu.vector_store %arg5[%c1, %c4_11], %11 {strides = array<i32>} : memref<36x128xf32, #tpu.memory_space<vmem>>, vector<16x64xf32>,
    %cst_12 = arith.constant 0.000000e+00 : f32
    %13 = vector.broadcast %cst_12 : f32 to vector<1x64xf32>
    %c18 = arith.constant 18 : index
    %c4_13 = arith.constant 4 : index
    %14 = vector.load %arg5[%c18, %c4_13] : memref<36x128xf32, #tpu.memory_space<vmem>>, vector<1x64xf32>
    tpu.vector_store %arg5[%c18, %c4_13], %13 {strides = array<i32>} : memref<36x128xf32, #tpu.memory_space<vmem>>, vector<1x64xf32>,
    %cst_14 = arith.constant 0.000000e+00 : f32
    %15 = vector.broadcast %cst_14 : f32 to vector<1x64xf32>
    %c35 = arith.constant 35 : index
    %c4_15 = arith.constant 4 : index
    %16 = vector.load %arg5[%c35, %c4_15] : memref<36x128xf32, #tpu.memory_space<vmem>>, vector<1x64xf32>
    tpu.vector_store %arg5[%c35, %c4_15], %15 {strides = array<i32>} : memref<36x128xf32, #tpu.memory_space<vmem>>, vector<1x64xf32>,
    %c1_16 = arith.constant 1 : index
    %c0_17 = arith.constant 0 : index
    %c0_18 = arith.constant 0 : index
    %17 = vector.load %arg1[%c1_16, %c0_17, %c0_18] : memref<2x16x64xf32, #tpu.memory_space<vmem>>, vector<1x16x64xf32>
    %18 = vector.shape_cast %17 : vector<1x16x64xf32> to vector<16x64xf32>
    %cst_19 = arith.constant 0.000000e+00 : f32
    %19 = vector.broadcast %cst_19 : f32 to vector<16x64xf32>
    %20 = arith.maximumf %18, %19 : vector<16x64xf32>
    %c19 = arith.constant 19 : index
    %c4_20 = arith.constant 4 : index
    %21 = vector.load %arg5[%c19, %c4_20] : memref<36x128xf32, #tpu.memory_space<vmem>>, vector<16x64xf32>
    tpu.vector_store %arg5[%c19, %c4_20], %20 {strides = array<i32>} : memref<36x128xf32, #tpu.memory_space<vmem>>, vector<16x64xf32>,
    %c0_21 = arith.constant 0 : index
    %c0_22 = arith.constant 0 : index
    %22 = vector.load %arg5[%c0_21, %c0_22] : memref<36x128xf32, #tpu.memory_space<vmem>>, vector<16x128xf32>
    %23 = arith.truncf %22 : vector<16x128xf32> to vector<16x128xbf16>
    %c0_23 = arith.constant 0 : index
    %c0_24 = arith.constant 0 : index
    %24 = vector.load %arg6[%c0_23, %c0_24] : memref<32x384xbf16, #tpu.memory_space<vmem>>, vector<16x128xbf16>
    tpu.vector_store %arg6[%c0_23, %c0_24], %23 {strides = array<i32>} : memref<32x384xbf16, #tpu.memory_space<vmem>>, vector<16x128xbf16>,
    %c1_25 = arith.constant 1 : index
    %c0_26 = arith.constant 0 : index
    %25 = vector.load %arg5[%c1_25, %c0_26] : memref<36x128xf32, #tpu.memory_space<vmem>>, vector<16x128xf32>
    %26 = arith.truncf %25 : vector<16x128xf32> to vector<16x128xbf16>
    %c0_27 = arith.constant 0 : index
    %c128 = arith.constant 128 : index
    %27 = vector.load %arg6[%c0_27, %c128] : memref<32x384xbf16, #tpu.memory_space<vmem>>, vector<16x128xbf16>
    tpu.vector_store %arg6[%c0_27, %c128], %26 {strides = array<i32>} : memref<32x384xbf16, #tpu.memory_space<vmem>>, vector<16x128xbf16>,
    %c2 = arith.constant 2 : index
    %c0_28 = arith.constant 0 : index
    %28 = vector.load %arg5[%c2, %c0_28] : memref<36x128xf32, #tpu.memory_space<vmem>>, vector<16x128xf32>
    %29 = arith.truncf %28 : vector<16x128xf32> to vector<16x128xbf16>
    %c0_29 = arith.constant 0 : index
    %c256 = arith.constant 256 : index
    %30 = vector.load %arg6[%c0_29, %c256] : memref<32x384xbf16, #tpu.memory_space<vmem>>, vector<16x128xbf16>
    tpu.vector_store %arg6[%c0_29, %c256], %29 {strides = array<i32>} : memref<32x384xbf16, #tpu.memory_space<vmem>>, vector<16x128xbf16>,
    %c18_30 = arith.constant 18 : index
    %c0_31 = arith.constant 0 : index
    %31 = vector.load %arg5[%c18_30, %c0_31] : memref<36x128xf32, #tpu.memory_space<vmem>>, vector<16x128xf32>
    %32 = arith.truncf %31 : vector<16x128xf32> to vector<16x128xbf16>
    %c16 = arith.constant 16 : index
    %c0_32 = arith.constant 0 : index
    %33 = vector.load %arg6[%c16, %c0_32] : memref<32x384xbf16, #tpu.memory_space<vmem>>, vector<16x128xbf16>
    tpu.vector_store %arg6[%c16, %c0_32], %32 {strides = array<i32>} : memref<32x384xbf16, #tpu.memory_space<vmem>>, vector<16x128xbf16>,
    %c19_33 = arith.constant 19 : index
    %c0_34 = arith.constant 0 : index
    %34 = vector.load %arg5[%c19_33, %c0_34] : memref<36x128xf32, #tpu.memory_space<vmem>>, vector<16x128xf32>
    %35 = arith.truncf %34 : vector<16x128xf32> to vector<16x128xbf16>
    %c16_35 = arith.constant 16 : index
    %c128_36 = arith.constant 128 : index
    %36 = vector.load %arg6[%c16_35, %c128_36] : memref<32x384xbf16, #tpu.memory_space<vmem>>, vector<16x128xbf16>
    tpu.vector_store %arg6[%c16_35, %c128_36], %35 {strides = array<i32>} : memref<32x384xbf16, #tpu.memory_space<vmem>>, vector<16x128xbf16>,
    %c20 = arith.constant 20 : index
    %c0_37 = arith.constant 0 : index
    %37 = vector.load %arg5[%c20, %c0_37] : memref<36x128xf32, #tpu.memory_space<vmem>>, vector<16x128xf32>
    %38 = arith.truncf %37 : vector<16x128xf32> to vector<16x128xbf16>
    %c16_38 = arith.constant 16 : index
    %c256_39 = arith.constant 256 : index
    %39 = vector.load %arg6[%c16_38, %c256_39] : memref<32x384xbf16, #tpu.memory_space<vmem>>, vector<16x128xbf16>
    tpu.vector_store %arg6[%c16_38, %c256_39], %38 {strides = array<i32>} : memref<32x384xbf16, #tpu.memory_space<vmem>>, vector<16x128xbf16>,
    %c0_40 = arith.constant 0 : index
    %c0_41 = arith.constant 0 : index
    %40 = vector.load %arg6[%c0_40, %c0_41] : memref<32x384xbf16, #tpu.memory_space<vmem>>, vector<32x384xbf16>
    %c0_42 = arith.constant 0 : index
    %c0_43 = arith.constant 0 : index
    %41 = vector.load %arg2[%c0_42, %c0_43] : memref<384x128xbf16, #tpu.memory_space<vmem>>, vector<384x128xbf16>
    %cst_44 = arith.constant dense<0.000000e+00> : vector<32x128xf32>
    %42 = tpu.matmul %40, %41, %cst_44 {dimension_numbers = #tpu.dot_dimension_numbers<[1], [0], [0], [1], [0, 0, 1, 1], [], []>} : vector<32x384xbf16>, vector<384x128xbf16>, vector<32x128xf32> -> vector<32x128xf32>
    %c0_45 = arith.constant 0 : index
    %c0_46 = arith.constant 0 : index
    %43 = vector.load %arg3[%c0_45, %c0_46] : memref<1x128xf32, #tpu.memory_space<vmem>>, vector<1x128xf32>
    %44 = vector.broadcast %43 : vector<1x128xf32> to vector<32x128xf32>
    %45 = arith.addf %42, %44 : vector<32x128xf32>
    %46 = vector.extract_strided_slice %45 {offsets = [0, 0], sizes = [16, 128], strides = [1, 1]} : vector<32x128xf32> to vector<16x128xf32>
    %c0_47 = arith.constant 0 : index
    %c0_48 = arith.constant 0 : index
    %c0_49 = arith.constant 0 : index
    %47 = vector.load %arg4[%c0_47, %c0_48, %c0_49] : memref<2x16x128xf32, #tpu.memory_space<vmem>>, vector<1x16x128xf32>
    %48 = vector.shape_cast %47 : vector<1x16x128xf32> to vector<16x128xf32>
    %49 = vector.shape_cast %46 : vector<16x128xf32> to vector<1x16x128xf32>
    tpu.vector_store %arg4[%c0_47, %c0_48, %c0_49], %49 {strides = array<i32>} : memref<2x16x128xf32, #tpu.memory_space<vmem>>, vector<1x16x128xf32>,
    %50 = vector.extract_strided_slice %45 {offsets = [16, 0], sizes = [16, 128], strides = [1, 1]} : vector<32x128xf32> to vector<16x128xf32>
    %c1_50 = arith.constant 1 : index
    %c0_51 = arith.constant 0 : index
    %c0_52 = arith.constant 0 : index
    %51 = vector.load %arg4[%c1_50, %c0_51, %c0_52] : memref<2x16x128xf32, #tpu.memory_space<vmem>>, vector<1x16x128xf32>
    %52 = vector.shape_cast %51 : vector<1x16x128xf32> to vector<16x128xf32>
    %53 = vector.shape_cast %50 : vector<16x128xf32> to vector<1x16x128xf32>
    tpu.vector_store %arg4[%c1_50, %c0_51, %c0_52], %53 {strides = array<i32>} : memref<2x16x128xf32, #tpu.memory_space<vmem>>, vector<1x16x128xf32>,
    return
  }
  func.func @transform_0(%arg0: i32) -> (i32, i32, i32) {
    %c0_i32 = arith.constant 0 : i32
    %c0_i32_0 = arith.constant 0 : i32
    %c0_i32_1 = arith.constant 0 : i32
    return %arg0, %c0_i32, %c0_i32_0 : i32, i32, i32
  }
  func.func @transform_1(%arg0: i32) -> (i32, i32) {
    %c0_i32 = arith.constant 0 : i32
    %c0_i32_0 = arith.constant 0 : i32
    %c0_i32_1 = arith.constant 0 : i32
    return %c0_i32, %c0_i32_0 : i32, i32
  }
  func.func @transform_2(%arg0: i32) -> (i32, i32) {
    %c0_i32 = arith.constant 0 : i32
    %c0_i32_0 = arith.constant 0 : i32
    %c0_i32_1 = arith.constant 0 : i32
    return %c0_i32, %c0_i32_0 : i32, i32
  }
  func.func @transform_3(%arg0: i32) -> (i32, i32, i32) {
    %c0_i32 = arith.constant 0 : i32
    %c0_i32_0 = arith.constant 0 : i32
    %c0_i32_1 = arith.constant 0 : i32
    return %arg0, %c0_i32, %c0_i32_0 : i32, i32, i32
  }
}

</mosaic_0001>

<bundles_post_ra>
// kernel: tpu_custom_call.1
= control target key start
LH: loop header
LB: loop body
LE: loop exit
PB: predicated region body
PF: predicated region fallthrough
CT: control target
= control target key end

     0   :  { %8 = vsyncpa [#allocation5], 0  ;;  %s712_s0 = inlined_call_operand.hbm [shape: f32[2,16,64], index: 0, kind: input, shape index: {}]   ;;  %s713_s1 = inlined_call_operand.hbm [shape: bf16[384,128], index: 1, kind: input, shape index: {}]   ;;  %s714_s2 = inlined_call_operand.vmem [shape: f32[1,128], index: 2, kind: input, shape index: {}]   ;;  %s715_s3 = inlined_call_operand.hbm [shape: f32[2,16,128], index: 3, kind: output, shape index: {}]  }
   0x1   :  { %9 = vsyncpa [#allocation8], 0 }
   0x2   :  { %10 = vsyncpa [#allocation6], 0  ;;  %s630_s12 = smov [#allocation4]   ;;  %s558_s16 = scalar_lea.hbm %s712_s0, 512 }
   0x3   :  { %s16_s13 = sshll.u32 %s630_s12, 4  ;;  %p559_p0 = scmp.ne.s32.totalorder %s712_s0, %s558_s16  ;;  %s17_s13 = int_to_ptr.vmem [resolvable:$true] %s16_s13 }
   0x4   :  { %p562_p1 = scmp.lt.u32.totalorder %s558_s16, %s712_s0 }
   0x6   :  { %p564_p2 = pnand %p562_p1, %p559_p0 }
   0x8   :  { %567 = shalt.err (!%p564_p2)
}
   0x9   :  { %s568_s21 = scalar_lea.vmem %s17_s13, 512  ;;  %p573_p4 = scmp.lt.s32.totalorder %s17_s13, %s17_s13 }
   0xa   :  { %p569_p3 = scmp.ne.s32.totalorder %s17_s13, %s568_s21  ;;  %p574_p5 = scmp.lt.s32.totalorder %s568_s21, %s568_s21 }
   0xc   :  { %p575_p6 = por %p574_p5, %p573_p4 }
   0xe   :  { %p576_p7 = pnand %p575_p6, %p569_p3 }
  0x10   :  { %579 = shalt.err (!%p576_p7)
}
  0x11   :  { %s631_s22 = smov 128   ;;  %s632_s23 = smov 8  }
  0x12   :  { %22 = dma.hbm_to_vmem [thread:$0]  %s712_s0, 512, %s17_s13, [#allocation5], %s631_s22, %s631_s22, %s632_s23  }
  0x13   :  { %s633_s26 = smov [#allocation7]   ;;  %s580_s30 = scalar_lea.hbm %s713_s1, 3072 }
  0x14   :  { %s28_s27 = sshll.u32 %s633_s26, 4  ;;  %p581_p8 = scmp.ne.s32.totalorder %s713_s1, %s580_s30  ;;  %s29_s27 = int_to_ptr.vmem [resolvable:$true] %s28_s27 }
  0x15   :  { %p584_p9 = scmp.lt.u32.totalorder %s580_s30, %s713_s1 }
  0x17   :  { %p586_p10 = pnand %p584_p9, %p581_p8 }
  0x19   :  { %589 = shalt.err (!%p586_p10)
}
  0x1a   :  { %s590_s8 = scalar_lea.vmem %s29_s27, 3072  ;;  %p595_p12 = scmp.lt.s32.totalorder %s29_s27, %s29_s27 }
  0x1b   :  { %p591_p11 = scmp.ne.s32.totalorder %s29_s27, %s590_s8  ;;  %p596_p13 = scmp.lt.s32.totalorder %s590_s8, %s590_s8 }
  0x1d   :  { %p597_p0 = por %p596_p13, %p595_p12 }
  0x1f   :  { %p598_p1 = pnand %p597_p0, %p591_p11 }
  0x21   :  { %601 = shalt.err (!%p598_p1)
}
  0x22   :  { %s634_s0 = smov 64   ;;  %s635_s9 = smov 4  }
  0x23   :  { %34 = dma.hbm_to_vmem [thread:$0]  %s713_s1, 3072, %s29_s27, [#allocation8], %s634_s0, %s634_s0, %s635_s9  }
  0x24   :  { %624 = dma.done.wait [#allocation5], 512  }
  0x25   :  { %625 = vsyncadd [#allocation5], 4294966784 }
  0x26   :  { %626 = dma.done.wait [#allocation8], 3072  }
  0x27   :  { %627 = vsyncadd [#allocation8], 4294964224  ;;  %vm44_vm0 = vcmask 31744   ;;  %vm51_vm1 = vcmask 1048096   ;;  %vm58_vm2 = vcmask 548896   ;;  %v636_v0 = vmov 0.0  }
  0x28   :  { %45 = vst.msk [vmem:[#allocation2] sm:$0xff] %vm44_vm0, %v636_v0  ;;  %46 = vst.msk [vmem:[#allocation2 + $0x8] sm:$0xff] %vm44_vm0, %v636_v0  ;;  %vm49_vm3 = vcmask 27648   ;;  %vm56_vm4 = vcmask 1044000   ;;  %v61_v1 = vld [vmem:[#allocation4] sm:$0xff]  ;;  %v79_v2 = vld [vmem:[#allocation4 + $0x10] sm:$0xff] }
  0x29   :  { %47 = vst.msk [vmem:[#allocation2 + $0x10] sm:$0xff] %vm44_vm0, %v636_v0  ;;  %48 = vst.msk [vmem:[#allocation2 + $0x18] sm:$0xff] %vm44_vm0, %v636_v0  ;;  %v62_v3 = vld [vmem:[#allocation4 + $0x8] sm:$0xff]  ;;  %v63_v4 = vmax.f32 %v61_v1, 0.0  ;;  %v81_v5 = vmax.f32 %v79_v2, 0.0  ;;  %v80_v6 = vld [vmem:[#allocation4 + $0x18] sm:$0xff] }
  0x2a   :  { %52 = vst.msk [vmem:[#allocation2] sm:$0xff] %vm51_vm1, %v636_v0  ;;  %53 = vst.msk [vmem:[#allocation2 + $0x8] sm:$0xff] %vm51_vm1, %v636_v0  ;;  %v64_v7 = vmax.f32 %v62_v3, 0.0  ;;  %v534_v8 = vld [vmem:[#allocation7 + $0x40] sm:$0xff]   ;;  %v82_v9 = vmax.f32 %v80_v6, 0.0  ;;  %v537_v12 = vld [vmem:[#allocation7 + $0x48] sm:$0xff]  }
  0x2b   :  { %54 = vst.msk [vmem:[#allocation2 + $0x10] sm:$0xff] %vm51_vm1, %v636_v0  ;;  %55 = vst.msk [vmem:[#allocation2 + $0x18] sm:$0xff] %vm51_vm1, %v636_v0  ;;  %67 = vrot.lane.b32.xlu0 %v63_v4, %s635_s9  ;;  %85 = vrot.lane.b32.xlu1 %v81_v5, %s635_s9  ;;  %v535_v10 = vld [vmem:[#allocation7 + $0x80] sm:$0xff]   ;;  %v538_v13 = vld [vmem:[#allocation7 + $0x88] sm:$0xff]   ;;  %vm73_vm5 = vcmask 556064  }
  0x2c   :  { %50 = vst.msk [vmem:[#allocation2 + $0x20] sm:$0xf] %vm49_vm3, %v636_v0  ;;  %468 = vmatprep.subr.bf16.mxu0 %v534_v8  ;;  %v536_v11 = vld [vmem:[#allocation7] sm:$0xff]   ;;  %506 = vmatprep.subr.bf16.mxu1 %v535_v10  ;;  %v539_v14 = vld [vmem:[#allocation7 + $0x8] sm:$0xff]   ;;  %v540_v15 = vld [vmem:[#allocation7 + $0x50] sm:$0xff]  }
  0x2d   :  { %59 = vst.msk [vmem:[#allocation2] sm:$0x1] %vm58_vm2, %v636_v0  ;;  %60 = vst.msk [vmem:[#allocation2 + $0x11] sm:$0x1] %vm58_vm2, %v636_v0  ;;  %469 = vmatpush3.bf16.msra.mxu0 %v536_v11  ;;  %507 = vmatpush3.bf16.msra.mxu1 %v535_v10  ;;  %v541_v16 = vld [vmem:[#allocation7 + $0x90] sm:$0xff]   ;;  %v543_v18 = vld [vmem:[#allocation7 + $0x58] sm:$0xff]  }
  0x2e   :  { %76 = vst.msk [vmem:[#allocation2 + $0x12] sm:$0x1] %vm58_vm2, %v636_v0  ;;  %470 = vmatprep.subr.bf16.mxu0 %v537_v12  ;;  %508 = vmatprep.subr.bf16.mxu1 %v538_v13  ;;  %v542_v17 = vld [vmem:[#allocation7 + $0x10] sm:$0xff]   ;;  %v544_v19 = vld [vmem:[#allocation7 + $0x98] sm:$0xff]   ;;  %v546_v21 = vld [vmem:[#allocation7 + $0x60] sm:$0xff]  }
  0x2f   :  { %57 = vst.msk [vmem:[#allocation2 + $0x20] sm:$0xf] %vm56_vm4, %v636_v0  ;;  %69 = vrot.lane.b32.xlu0 %v64_v7, %s635_s9  ;;  %87 = vrot.lane.b32.xlu1 %v82_v9, %s635_s9  ;;  %v545_v20 = vld [vmem:[#allocation7 + $0x18] sm:$0xff]   ;;  %v547_v22 = vld [vmem:[#allocation7 + $0xa0] sm:$0xff]   ;;  %v549_v24 = vld [vmem:[#allocation7 + $0x68] sm:$0xff]  }
  0x30   :  { %77 = vst.msk [vmem:[#allocation2 + $0x23] sm:$0x1] %vm58_vm2, %v636_v0  ;;  %v548_v23 = vld [vmem:[#allocation7 + $0x20] sm:$0xff]   ;;  %v550_v25 = vld [vmem:[#allocation7 + $0xa8] sm:$0xff]   ;;  %v552_v27 = vld [vmem:[#allocation7 + $0x70] sm:$0xff]  }
  0x31   :  { %471 = vmatpush3.bf16.msra.mxu0 %v539_v14  ;;  %509 = vmatpush3.bf16.msra.mxu1 %v538_v13  ;;  %v551_v26 = vld [vmem:[#allocation7 + $0x28] sm:$0xff]   ;;  %v553_v28 = vld [vmem:[#allocation7 + $0xb0] sm:$0xff]   ;;  %v555_v30 = vld [vmem:[#allocation7 + $0x78] sm:$0xff]  }
  0x32   :  { %472 = vmatprep.subr.bf16.mxu0 %v540_v15  ;;  %510 = vmatprep.subr.bf16.mxu1 %v541_v16  ;;  %v554_v29 = vld [vmem:[#allocation7 + $0x30] sm:$0xff]   ;;  %v556_v31 = vld [vmem:[#allocation7 + $0xb8] sm:$0xff]  }
  0x33   :  { %v557_v32 = vld [vmem:[#allocation7 + $0x38] sm:$0xff]  }
  0x34   :  { %v443_v58 = vld [vmem:[%s714_s2] ss:$0 sm:$0xff]  ;;  %s637_s2 = smov [#allocation9]  }
  0x35   :  { %473 = vmatpush3.bf16.msra.mxu0 %v542_v17  ;;  %511 = vmatpush3.bf16.msra.mxu1 %v541_v16  ;;  %s430_s13 = sshll.u32 %s637_s2, 4  ;;  %s431_s13 = int_to_ptr.vmem [resolvable:$true] %s430_s13 }
  0x36   :  { %474 = vmatprep.subr.bf16.mxu0 %v543_v18  ;;  %512 = vmatprep.subr.bf16.mxu1 %v544_v19  ;;  %s602_s14 = scalar_lea.vmem %s431_s13, 512  ;;  %p607_p3 = scmp.lt.s32.totalorder %s431_s13, %s431_s13 }
  0x37   :  { %p603_p2 = scmp.ne.s32.totalorder %s431_s13, %s602_s14  ;;  %p608_p4 = scmp.lt.s32.totalorder %s602_s14, %s602_s14 }
  0x39   :  { %475 = vmatpush3.bf16.msra.mxu0 %v545_v20  ;;  %513 = vmatpush3.bf16.msra.mxu1 %v544_v19  ;;  %p609_p5 = por %p608_p4, %p607_p3 }
  0x3a   :  { %476 = vmatprep.subr.bf16.mxu0 %v546_v21  ;;  %514 = vmatprep.subr.bf16.mxu1 %v547_v22 }
  0x3b   :  { %p610_p6 = pnand %p609_p5, %p603_p2 }
  0x3d   :  { %477 = vmatpush3.bf16.msra.mxu0 %v548_v23  ;;  %515 = vmatpush3.bf16.msra.mxu1 %v547_v22 }
  0x3e   :  { %478 = vmatprep.subr.bf16.mxu0 %v549_v24  ;;  %516 = vmatprep.subr.bf16.mxu1 %v550_v25 }
  0x41   :  { %479 = vmatpush3.bf16.msra.mxu0 %v551_v26  ;;  %517 = vmatpush3.bf16.msra.mxu1 %v550_v25 }
  0x42   :  { %480 = vmatprep.subr.bf16.mxu0 %v552_v27  ;;  %518 = vmatprep.subr.bf16.mxu1 %v553_v28 }
  0x45   :  { %481 = vmatpush3.bf16.msra.mxu0 %v554_v29  ;;  %519 = vmatpush3.bf16.msra.mxu1 %v553_v28 }
  0x46   :  { %482 = vmatprep.subr.bf16.mxu0 %v555_v30  ;;  %520 = vmatprep.subr.bf16.mxu1 %v556_v31 }
  0x49   :  { %483 = vmatpush3.bf16.msra.mxu0 %v557_v32  ;;  %521 = vmatpush3.bf16.msra.mxu1 %v556_v31 }
  0x9d   :  { %v68_v33 = vpop.permute.xlu0 %67  ;;  %v86_v34 = vpop.permute.xlu1 %85 }
  0x9e   :  { %74 = vst.msk [vmem:[#allocation2 + $0x1] sm:$0xff] %vm73_vm5, %v68_v33  ;;  %91 = vst.msk [vmem:[#allocation2 + $0x13] sm:$0xff] %vm73_vm5, %v86_v34 }
  0xa1   :  { %v70_v35 = vpop.permute.xlu0 %69  ;;  %v88_v36 = vpop.permute.xlu1 %87 }
  0xa2   :  { %75 = vst.msk [vmem:[#allocation2 + $0x9] sm:$0xff] %vm73_vm5, %v70_v35  ;;  %92 = vst.msk [vmem:[#allocation2 + $0x1b] sm:$0xff] %vm73_vm5, %v88_v36 }
  0xa5   :  { %v97_v37 = vld [vmem:[#allocation2 + $0x1] sm:$0xff]  ;;  %v109_v39 = vld [vmem:[#allocation2 + $0x13] sm:$0xff] }
  0xa6   :  { %v93_v38 = vld [vmem:[#allocation2] sm:$0xff]  ;;  %v105_v52 = vld [vmem:[#allocation2 + $0x12] sm:$0xff] }
  0xa9   :  { %v98_v40 = vld [vmem:[#allocation2 + $0x9] sm:$0xff]  ;;  %v113_v46 = vld [vmem:[#allocation2 + $0x14] sm:$0xff]  ;;  %v114_v47 = vld [vmem:[#allocation2 + $0x1c] sm:$0xff] }
  0xaa   :  { %v101_v41 = vld [vmem:[#allocation2 + $0x2] sm:$0xff]  ;;  %v102_v42 = vld [vmem:[#allocation2 + $0xa] sm:$0xff]  ;;  %v99_v43 = vpack.c.bf16 %v98_v40, %v97_v37  ;;  %v115_v49 = vpack.c.bf16 %v114_v47, %v113_v46  ;;  %v106_v53 = vld [vmem:[#allocation2 + $0x1a] sm:$0xff] }
  0xab   :  { %v103_v44 = vpack.c.bf16 %v102_v42, %v101_v41  ;;  %v94_v45 = vld [vmem:[#allocation2 + $0x8] sm:$0xff]  ;;  %v110_v50 = vld [vmem:[#allocation2 + $0x1b] sm:$0xff]  ;;  %v107_v54 = vpack.c.bf16 %v106_v53, %v105_v52 }
  0xac   :  { %v95_v48 = vpack.c.bf16 %v94_v45, %v93_v38  ;;  %354 = vmatprep.mubr.bf16.mxu0 %v99_v43  ;;  %v111_v51 = vpack.c.bf16 %v110_v50, %v109_v39 }
  0xad   :  { %522 = vmatprep.mubr.bf16.mxu1 %v103_v44 }
  0xae   :  { %355 = vmatmul.mubr.bf16.vlgmr.msra.gmra.mrb[0].mxu0 %v95_v48  ;;  %523 = vmatmul.mubr.bf16.vlgmr.msra.gmra.mrb[0].mxu1 %v115_v49 }
  0xaf   :  { %362 = vmatprep.mubr.bf16.mxu0 %v111_v51 }
  0xb6   :  { %363 = vmatmul.mubr.bf16.gmra.mrb[4].mxu0 %v107_v54 }
 0x181   :  { %v484_v55 = vpop.f32.mrb[0].mxu0  ;;  %v524_v56 = vpop.f32.mrb[0].mxu1 }
 0x182   :  { %v485_v57 = vpop.f32.mrb[1].mxu0  ;;  %v405_v59 = vpop.f32.mrb[1].mxu1 }
 0x183   :  { %v486_v60 = vadd.f32 %v485_v57, %v484_v55  ;;  %v487_v61 = vpop.f32.mrb[2].mxu0  ;;  %v525_v62 = vpop.f32.mrb[2].mxu1 }
 0x184   :  { %v488_v63 = vpop.f32.mrb[3].mxu0  ;;  %v408_v0 = vpop.f32.mrb[3].mxu1 }
 0x185   :  { %v357_v1 = vadd.f32 %v486_v60, %v443_v58  ;;  %v489_v2 = vadd.f32 %v488_v63, %v487_v61 }
 0x187   :  { %v406_v3 = vadd.f32 %v405_v59, %v357_v1  ;;  %v360_v4 = vadd.f32 %v489_v2, %v443_v58 }
 0x189   :  { %420 = vst [vmem:[#allocation9] sm:$0xff] %v406_v3  ;;  %v409_v5 = vadd.f32 %v408_v0, %v360_v4  ;;  %v490_v6 = vpop.f32.mrb[4].mxu0 }
 0x18a   :  { %v491_v7 = vpop.f32.mrb[5].mxu0 }
 0x18b   :  { %421 = vst [vmem:[#allocation9 + $0x8] sm:$0xff] %v409_v5  ;;  %v492_v8 = vadd.f32 %v491_v7, %v490_v6  ;;  %v493_v9 = vpop.f32.mrb[6].mxu0 }
 0x18c   :  { %v494_v10 = vpop.f32.mrb[7].mxu0 }
 0x18d   :  { %v365_v11 = vadd.f32 %v492_v8, %v443_v58  ;;  %v495_v12 = vadd.f32 %v494_v10, %v493_v9 }
 0x18f   :  { %v414_v13 = vadd.f32 %v524_v56, %v365_v11  ;;  %v368_v14 = vadd.f32 %v495_v12, %v443_v58 }
 0x191   :  { %423 = vst [vmem:[#allocation9 + $0x10] sm:$0xff] %v414_v13  ;;  %v417_v15 = vadd.f32 %v525_v62, %v368_v14 }
 0x193   :  { %424 = vst [vmem:[#allocation9 + $0x18] sm:$0xff] %v417_v15 }
 0x194   :  { %613 = shalt.err (!%p610_p6)
}
 0x195   :  { %s614_s17 = scalar_lea.hbm %s715_s3, 512 }
 0x196   :  { %p615_p7 = scmp.ne.s32.totalorder %s715_s3, %s614_s17  ;;  %p618_p8 = scmp.lt.u32.totalorder %s614_s17, %s715_s3 }
 0x198   :  { %p620_p9 = pnand %p618_p8, %p615_p7 }
 0x19a   :  { %623 = shalt.err (!%p620_p9)
}
 0x19b   :  { %436 = dma.vmem_to_hbm [thread:$0]  %s431_s13, 512, %s715_s3, [#allocation6], %s631_s22, %s631_s22, %s632_s23  }
 0x19c   :  { %628 = dma.done.wait [#allocation6], 512  }
 0x19d   :  { %629 = vsyncadd [#allocation6], 4294966784 }
 0x19e   :  { %440 = vsyncpa [#allocation5], 1 }
 0x19f   :  { %441 = vsyncpa [#allocation8], 1 }
 0x1a0   :  { %442 = vsyncpa [#allocation6], 1 }

</bundles_post_ra>
